<compile_context>
chip_gen: v7x
topology: tpu7x:2x2x1
jax: 0.10.0
libtpu: 0.0.40
codegen_flags: <defaults>
</compile_context>

<pallas_src>
import jax
import jax.numpy as jnp
from jax import lax
from jax.experimental import pallas as pl
from jax.experimental.pallas import tpu as pltpu


def mlp_kernel(x_ref, w1_ref, b1_ref, w2_ref, b2_ref, w3_ref, b3_ref, oT_ref):
    """One batch tile of  y^T = W3 @ relu(W2 @ relu(W1 @ x^T + b1) + b2) + b3.

    x_ref is batch-major [tb, F]; the feature contraction is done with
    dot_general (contract W's F axis with x's F axis), so no explicit
    transpose / wrapper-side x.T is needed.  All outputs are feature-major
    so the batch dimension sits on the lane axis (lane-dense stores).
    """
    x = x_ref[...]                                                     # [tb, F]

    # fc1 + relu:  W1 [H1, F]  contracted with  x [tb, F]  ->  [H1, tb]
    h1 = lax.dot_general(w1_ref[...], x, (((1,), (1,)), ((), ())),
                         preferred_element_type=jnp.float32) + b1_ref[...]
    h1 = jnp.maximum(h1, 0.0)                                          # [H1, tb]

    # fc2 + relu:  W2 [H2, H1] @ h1 [H1, tb] -> [H2, tb]
    h2 = jnp.dot(w2_ref[...], h1, preferred_element_type=jnp.float32) + b2_ref[...]
    h2 = jnp.maximum(h2, 0.0)                                          # [H2, tb]

    # out (no activation): W3 [OUT, H2] @ h2 -> [OUT, tb], lane-dense store.
    oT_ref[...] = (jnp.dot(w3_ref[...], h2, preferred_element_type=jnp.float32)
                   + b3_ref[...]).astype(oT_ref.dtype)                 # [OUT, tb]


def _round_up(n, m):
    return ((n + m - 1) // m) * m


def mlp_forward(x, params, *, block_b=4096, small_batch_cutoff=256,
                transpose_output=True):
    """x: [B, F] (batch-major, as stored); params in PyTorch nn.Linear layout
    (W: [out, in], b: [out]).  Returns [B, OUT] (or [OUT, B] feature-major if
    transpose_output=False, for consumers that can take it)."""
    w1, b1, w2, b2, w3, b3 = params
    B, F_in = x.shape
    H1, H2, OUT = w1.shape[0], w2.shape[0], w3.shape[0]

    # Only the (tiny) biases are reshaped on the host; x is passed as-is.
    b1c = b1.astype(jnp.float32)[:, None]              # [H1, 1]
    b2c = b2.astype(jnp.float32)[:, None]              # [H2, 1]
    b3c = b3.astype(jnp.float32)[:, None]              # [OUT, 1]

    args = (x, w1, b1c, w2, b2c, w3, b3c)
    out_shape = jax.ShapeDtypeStruct((OUT, B), jnp.float32)

    if B <= small_batch_cutoff:
        # Tiny batch: single shot, no grid, no software-pipeline overhead.
        oT = pl.pallas_call(
            mlp_kernel,
            out_shape=out_shape,
            in_specs=[pl.BlockSpec(memory_space=pltpu.MemorySpace.VMEM)] * len(args),
            out_specs=pl.BlockSpec(memory_space=pltpu.MemorySpace.VMEM),
        )(*args)
    else:
        # Large batch: tile over batch only; weights/biases stay VMEM-resident.
        # Cap the tile at ceil(B/2) (rounded to 256) so there are always >= 2
        # grid steps -> both TensorCores get work on v7x.
        tb = max(256, min(block_b, _round_up(-(-B // 2), 256)))
        grid = (pl.cdiv(B, tb),)
        oT = pl.pallas_call(
            mlp_kernel,
            out_shape=out_shape,
            grid=grid,
            in_specs=[
                pl.BlockSpec((tb, F_in), lambda i: (i, 0)),   # x tile, contiguous rows
                pl.BlockSpec((H1, F_in), lambda i: (0, 0)),   # W1 (resident)
                pl.BlockSpec((H1, 1), lambda i: (0, 0)),      # b1 (resident)
                pl.BlockSpec((H2, H1), lambda i: (0, 0)),     # W2 (resident)
                pl.BlockSpec((H2, 1), lambda i: (0, 0)),      # b2 (resident)
                pl.BlockSpec((OUT, H2), lambda i: (0, 0)),    # W3 (resident)
                pl.BlockSpec((OUT, 1), lambda i: (0, 0)),     # b3 (resident)
            ],
            out_specs=pl.BlockSpec((OUT, tb), lambda i: (0, i)),   # lane-dense
            compiler_params=pltpu.CompilerParams(
                dimension_semantics=("parallel",),     # dual-TC sharding on v7x
                vmem_limit_bytes=32 * 1024 * 1024),    # explicit for v5e headroom
        )(*args)

    # Output transpose is cheap (3 x B floats); keep the [B, OUT] module contract
    # by default, but allow feature-major output for fused consumers.
    return oT.T if transpose_output else oT


def mlp_reference(x, params):
    w1, b1, w2, b2, w3, b3 = params
    h = jnp.maximum(x @ w1.T + b1, 0.0)
    h = jnp.maximum(h @ w2.T + b2, 0.0)
    return h @ w3.T + b3


def init_params(key, in_features=13, h1=10, h2=10, out_features=3):
    # Mimic nn.Linear's U(-1/sqrt(fan_in), 1/sqrt(fan_in)); W in [out, in] layout.
    ks = jax.random.split(key, 6)

    def lin(kw, kb, fan_in, fan_out):
        bound = 1.0 / jnp.sqrt(fan_in)
        w = jax.random.uniform(kw, (fan_out, fan_in), jnp.float32, -bound, bound)
        b = jax.random.uniform(kb, (fan_out,), jnp.float32, -bound, bound)
        return w, b

    w1, b1 = lin(ks[0], ks[1], in_features, h1)
    w2, b2 = lin(ks[2], ks[3], h1, h2)
    w3, b3 = lin(ks[4], ks[5], h2, out_features)
    return w1, b1, w2, b2, w3, b3


if __name__ == "__main__":
    key = jax.random.PRNGKey(0)
    kx1, kx2, kx3, kp = jax.random.split(key, 4)

    IN, H1, H2, OUT = 13, 10, 10, 3
    params = init_params(kp, IN, H1, H2, OUT)

    # 1) Tiny batch -> grid-free single-shot kernel (no wrapper transpose).
    x_small = jax.random.normal(kx1, (8, IN), jnp.float32)
    out_small = jax.block_until_ready(mlp_forward(x_small, params))
    ref_small = mlp_reference(x_small, params)
    assert out_small.shape == (8, OUT)
    assert jnp.allclose(out_small, ref_small, atol=1e-4, rtol=1e-4)

    # 2) Larger batch -> batch-tiled kernel: tile capped at ceil(B/2) -> 2 grid
    #    steps (parallel batch axis, weights resident, lane-dense output).
    x_big = jax.random.normal(kx2, (1024, IN), jnp.float32)
    out_big = jax.block_until_ready(mlp_forward(x_big, params))
    ref_big = mlp_reference(x_big, params)
    assert out_big.shape == (1024, OUT)
    assert jnp.allclose(out_big, ref_big, atol=1e-4, rtol=1e-4)

    # 3) Ragged batch (B not a multiple of the tile) -> exercises masked
    #    writeback of the partial final tile.
    x_rag = jax.random.normal(kx3, (1000, IN), jnp.float32)
    out_rag = jax.block_until_ready(mlp_forward(x_rag, params))
    ref_rag = mlp_reference(x_rag, params)
    assert out_rag.shape == (1000, OUT)
    assert jnp.allclose(out_rag, ref_rag, atol=1e-4, rtol=1e-4)

    # 4) Feature-major output path (skips the final wrapper transpose).
    out_fm = jax.block_until_ready(
        mlp_forward(x_big, params, transpose_output=False))
    assert out_fm.shape == (OUT, 1024)
    assert jnp.allclose(out_fm.T, ref_big, atol=1e-4, rtol=1e-4)

    print("KERNEL_OK")
</pallas_src>

<mosaic_0001>
module attributes {stable_mosaic.version = 11 : i64} {
  func.func @mlp_kernel(%arg0: memref<8x13xf32, #tpu.memory_space<vmem>>, %arg1: memref<10x13xf32, #tpu.memory_space<vmem>>, %arg2: memref<10x1xf32, #tpu.memory_space<vmem>>, %arg3: memref<10x10xf32, #tpu.memory_space<vmem>>, %arg4: memref<10x1xf32, #tpu.memory_space<vmem>>, %arg5: memref<3x10xf32, #tpu.memory_space<vmem>>, %arg6: memref<3x1xf32, #tpu.memory_space<vmem>>, %arg7: memref<3x8xf32, #tpu.memory_space<vmem>>) attributes {dimension_semantics = [], scalar_prefetch = 0 : i64, scratch_operands = 0 : i64, tpu.core_type = #tpu.core_type<tc>} {
    %c0 = arith.constant 0 : index
    %c0_0 = arith.constant 0 : index
    %0 = vector.load %arg0[%c0, %c0_0] : memref<8x13xf32, #tpu.memory_space<vmem>>, vector<8x13xf32>
    %c0_1 = arith.constant 0 : index
    %c0_2 = arith.constant 0 : index
    %1 = vector.load %arg1[%c0_1, %c0_2] : memref<10x13xf32, #tpu.memory_space<vmem>>, vector<10x13xf32>
    %cst = arith.constant dense<0.000000e+00> : vector<10x8xf32>
    %2 = tpu.matmul %1, %0, %cst {dimension_numbers = #tpu.dot_dimension_numbers<[1], [1], [0], [0], [0, 0, 1, 0], [], []>} : vector<10x13xf32>, vector<8x13xf32>, vector<10x8xf32> -> vector<10x8xf32>
    %c0_3 = arith.constant 0 : index
    %c0_4 = arith.constant 0 : index
    %3 = vector.load %arg2[%c0_3, %c0_4] : memref<10x1xf32, #tpu.memory_space<vmem>>, vector<10x1xf32>
    %4 = vector.broadcast %3 : vector<10x1xf32> to vector<10x8xf32>
    %5 = arith.addf %2, %4 : vector<10x8xf32>
    %cst_5 = arith.constant 0.000000e+00 : f32
    %6 = vector.broadcast %cst_5 : f32 to vector<10x8xf32>
    %7 = arith.maximumf %5, %6 : vector<10x8xf32>
    %c0_6 = arith.constant 0 : index
    %c0_7 = arith.constant 0 : index
    %8 = vector.load %arg3[%c0_6, %c0_7] : memref<10x10xf32, #tpu.memory_space<vmem>>, vector<10x10xf32>
    %cst_8 = arith.constant dense<0.000000e+00> : vector<10x8xf32>
    %9 = tpu.matmul %8, %7, %cst_8 {dimension_numbers = #tpu.dot_dimension_numbers<[1], [0], [0], [1], [0, 0, 1, 1], [], []>} : vector<10x10xf32>, vector<10x8xf32>, vector<10x8xf32> -> vector<10x8xf32>
    %c0_9 = arith.constant 0 : index
    %c0_10 = arith.constant 0 : index
    %10 = vector.load %arg4[%c0_9, %c0_10] : memref<10x1xf32, #tpu.memory_space<vmem>>, vector<10x1xf32>
    %11 = vector.broadcast %10 : vector<10x1xf32> to vector<10x8xf32>
    %12 = arith.addf %9, %11 : vector<10x8xf32>
    %cst_11 = arith.constant 0.000000e+00 : f32
    %13 = vector.broadcast %cst_11 : f32 to vector<10x8xf32>
    %14 = arith.maximumf %12, %13 : vector<10x8xf32>
    %c0_12 = arith.constant 0 : index
    %c0_13 = arith.constant 0 : index
    %15 = vector.load %arg5[%c0_12, %c0_13] : memref<3x10xf32, #tpu.memory_space<vmem>>, vector<3x10xf32>
    %cst_14 = arith.constant dense<0.000000e+00> : vector<3x8xf32>
    %16 = tpu.matmul %15, %14, %cst_14 {dimension_numbers = #tpu.dot_dimension_numbers<[1], [0], [0], [1], [0, 0, 1, 1], [], []>} : vector<3x10xf32>, vector<10x8xf32>, vector<3x8xf32> -> vector<3x8xf32>
    %c0_15 = arith.constant 0 : index
    %c0_16 = arith.constant 0 : index
    %17 = vector.load %arg6[%c0_15, %c0_16] : memref<3x1xf32, #tpu.memory_space<vmem>>, vector<3x1xf32>
    %18 = vector.broadcast %17 : vector<3x1xf32> to vector<3x8xf32>
    %19 = arith.addf %16, %18 : vector<3x8xf32>
    %c0_17 = arith.constant 0 : index
    %c0_18 = arith.constant 0 : index
    %20 = vector.load %arg7[%c0_17, %c0_18] : memref<3x8xf32, #tpu.memory_space<vmem>>, vector<3x8xf32>
    tpu.vector_store %arg7[%c0_17, %c0_18], %19 {strides = array<i32>} : memref<3x8xf32, #tpu.memory_space<vmem>>, vector<3x8xf32>,
    return
  }
}

</mosaic_0001>

<bundles_post_ra>
// kernel: tpu_custom_call.1
= control target key start
LH: loop header
LB: loop body
LE: loop exit
PB: predicated region body
PF: predicated region fallthrough
CT: control target
= control target key end

     0   :  { %12 = vsyncpa [#allocation3], 0  ;;  %s561_s0 = inlined_call_operand.hbm [shape: f32[8,13], index: 0, kind: input, shape index: {}]   ;;  %s562_s1 = inlined_call_operand.vmem [shape: f32[10,13], index: 1, kind: input, shape index: {}]   ;;  %s563_s2 = inlined_call_operand.vmem [shape: f32[10,1], index: 2, kind: input, shape index: {}]   ;;  %s564_s3 = inlined_call_operand.vmem [shape: f32[10,10], index: 3, kind: input, shape index: {}]   ;;  %s565_s4 = inlined_call_operand.vmem [shape: f32[10,1], index: 4, kind: input, shape index: {}]   ;;  %s566_s5 = inlined_call_operand.vmem [shape: f32[3,10], index: 5, kind: input, shape index: {}]   ;;  %s567_s6 = inlined_call_operand.vmem [shape: f32[3,1], index: 6, kind: input, shape index: {}]   ;;  %s568_s7 = inlined_call_operand.hbm [shape: f32[3,8], index: 7, kind: output, shape index: {}]  }
   0x1   :  { %13 = vsyncpa [#allocation4], 0  ;;  %s447_s24 = smov [#allocation2]   ;;  %s399_s28 = scalar_lea.hbm %s561_s0, 128 }
   0x2   :  { %s20_s25 = sshll.u32 %s447_s24, 4  ;;  %p400_p0 = scmp.ne.s32.totalorder %s561_s0, %s399_s28  ;;  %s21_s25 = int_to_ptr.vmem [resolvable:$true] %s20_s25 }
   0x3   :  { %p403_p1 = scmp.lt.u32.totalorder %s399_s28, %s561_s0 }
   0x5   :  { %p405_p2 = pnand %p403_p1, %p400_p0 }
   0x7   :  { %408 = shalt.err (!%p405_p2)
}
   0x8   :  { %s409_s10 = scalar_lea.vmem %s21_s25, 128  ;;  %p414_p4 = scmp.lt.s32.totalorder %s21_s25, %s21_s25 }
   0x9   :  { %p410_p3 = scmp.ne.s32.totalorder %s21_s25, %s409_s10  ;;  %p415_p5 = scmp.lt.s32.totalorder %s409_s10, %s409_s10 }
   0xb   :  { %p416_p6 = por %p415_p5, %p414_p4 }
   0xd   :  { %p417_p7 = pnand %p416_p6, %p410_p3 }
   0xf   :  { %420 = shalt.err (!%p417_p7)
}
  0x10   :  { %23 = dma.hbm_to_vmem [thread:$0]  %s561_s0, 128, %s21_s25, [#allocation3]  }
  0x11   :  { %443 = dma.done.wait [#allocation3], 128  }
  0x12   :  { %444 = vsyncadd [#allocation3], 4294967168  ;;  %v448_v0 = vmov 0   ;;  %vm54_vm0 = vcmask 105472   ;;  %v39_v1 = vld [vmem:[#allocation2] sm:$0xff]  ;;  %vm155_vm1 = vcmask 80896  }
  0x13   :  { %397 = vset.pattern.permute.xlu0 %v448_v0  ;;  %398 = vset.pattern.permute.xlu1 %v448_v0  ;;  %v40_v2 = vld [vmem:[%s562_s1] sm:$0xff]  ;;  %v41_v4 = vld [vmem:[%s562_s1 + $0x8] sm:$0x3]  ;;  %vm162_vm2 = vcmask 1041408   ;;  %vm449_vm3 = vmmov 1   ;;  %v450_v21 = vmov 0.0|0.0  }
  0x14   :  { %361 = vmatprep.subr.msk.mxu0 %vm54_vm0, %v39_v1  ;;  %363 = vmatprep.mubr.msk.f32.mxu0 %vm54_vm0, %v40_v2  ;;  %v42_v3 = vld [vmem:[%s563_s2] sm:$0xff]  ;;  %v43_v5 = vld [vmem:[%s563_s2 + $0x8] sm:$0x3]  ;;  %vm531_vm4 = vmpackc.low %vm162_vm2, %vm449_vm3  ;;  %vm451_vm5 = vmmov 0   ;;  %v452_v22 = vmov 0.0   ;;  %s453_s27 = smov [#allocation5]  }
  0x15   :  { %362 = vmatpush3.xpose.msk.msra.mxu0 %vm54_vm0, %v39_v1  ;;  %46 = vperm.xlu0 %397, %v42_v3   ;;  %v244_v6 = vld [vmem:[%s567_s6] sm:$0x7]  ;;  %v144_v9 = vld [vmem:[%s565_s4 + $0x8] sm:$0x3]  ;;  %s334_s28 = sshll.u32 %s453_s27, 4  ;;  %vm326_vm6 = vcmask 59392   ;;  %s335_s28 = int_to_ptr.vmem [resolvable:$true] %s334_s28 }
  0x16   :  { %v141_v7 = vld [vmem:[%s564_s3] sm:$0xff]  ;;  %v142_v20 = vld [vmem:[%s564_s3 + $0x8] sm:$0x3]  ;;  %386 = vmatprep.subr.bf16.mxu0 %v450_v21  ;;  %s421_s29 = scalar_lea.vmem %s335_s28, 64  ;;  %p426_p9 = scmp.lt.s32.totalorder %s335_s28, %s335_s28 }
  0x17   :  { %370 = vmatprep.mubr.msk.f32.mxu1 %vm155_vm1, %v141_v7  ;;  %v143_v8 = vld [vmem:[%s565_s4] sm:$0xff]  ;;  %p422_p8 = scmp.ne.s32.totalorder %s335_s28, %s421_s29  ;;  %p427_p10 = scmp.lt.s32.totalorder %s421_s29, %s421_s29 }
  0x18   :  { %364 = vmatmul.mubr.msk.f32.vlgmr.msra.gmra.mrb[0].mxu0 %vm54_vm0, %v41_v4  ;;  %147 = vperm.xlu1 %398, %v143_v8   ;;  %v243_v32 = vld [vmem:[%s566_s5] sm:$0x7] }
  0x19   :  { %51 = vperm.xlu0 %397, %v43_v5   ;;  %377 = vmatprep.mubr.msk.f32.mxu0 %vm451_vm5, %v452_v22  ;;  %p428_p11 = por %p427_p10, %p426_p9 }
  0x1b   :  { %p429_p12 = pnand %p428_p11, %p422_p8 }
  0x1c   :  { %152 = vperm.xlu1 %398, %v144_v9  }
  0x1d   :  { %247 = vperm.xlu0 %397, %v244_v6  }
  0x94   :  { %v47_v10 = vpop.permute.xlu0 %46 }
  0x97   :  { %v148_v23 = vpop.permute.xlu1 %147 }
  0x98   :  { %v52_v11 = vpop.permute.xlu0 %51 }
  0x9b   :  { %v153_v24 = vpop.permute.xlu1 %152 }
  0x9c   :  { %v248_v33 = vpop.permute.xlu0 %247 }
  0xeb   :  { %v365_v12 = vpop.f32.mrb[0].mxu0 }
  0xec   :  { %v136_v13 = vadd.f32 %v365_v12, %v52_v11  ;;  %v130_v14 = vpop.f32.mrb[1].mxu0 }
  0xed   :  { %v131_v15 = vadd.f32 %v130_v14, %v47_v10 }
  0xee   :  { %v140_v16 = vmax.f32 %v136_v13, 0.0 }
  0xef   :  { %v139_v17 = vmax.f32 %v131_v15, 0.0 }
  0xf1   :  { %v380_v19 = vpack.c.bf16 %v140_v16, %v139_v17 }
  0xf3   :  { %382 = vmatprep.subr.msk.bf16.mxu1 %vm531_vm4, %v380_v19 }
  0xf4   :  { %385 = vmatpush3.bf16.msk.msra.mxu1 %vm531_vm4, %v380_v19 }
  0xf7   :  { %371 = vmatmul.mubr.msk.f32.vlgmr.msra.gmra.mrb[0].mxu1 %vm155_vm1, %v142_v20 }
 0x1ca   :  { %v372_v25 = vpop.f32.mrb[0].mxu1 }
 0x1cb   :  { %v238_v26 = vadd.f32 %v372_v25, %v153_v24  ;;  %v232_v27 = vpop.f32.mrb[1].mxu1 }
 0x1cc   :  { %v233_v28 = vadd.f32 %v232_v27, %v148_v23 }
 0x1cd   :  { %v242_v29 = vmax.f32 %v238_v26, 0.0 }
 0x1ce   :  { %v241_v30 = vmax.f32 %v233_v28, 0.0 }
 0x1d0   :  { %v387_v31 = vpack.c.bf16 %v242_v29, %v241_v30 }
 0x1d2   :  { %389 = vmatpush3.bf16.msk.msra.mxu0 %vm531_vm4, %v387_v31 }
 0x1d5   :  { %378 = vmatmul.mubr.msk.f32.vlgmr.msra.gmra.mrb[2].mxu0 %vm155_vm1, %v243_v32 }
 0x2a8   :  { %v322_v34 = vpop.f32.mrb[2].mxu0 }
 0x2a9   :  { %v323_v35 = vadd.f32 %v322_v34, %v248_v33  ;;  %v379_v36 = vpop.f32.mrb[3].mxu0 }
 0x2ab   :  { %327 = vst.msk [vmem:[#allocation5] sm:$0x7] %vm326_vm6, %v323_v35 }
 0x2ac   :  { %432 = shalt.err (!%p429_p12)
}
 0x2ad   :  { %s433_s8 = scalar_lea.hbm %s568_s7, 64 }
 0x2ae   :  { %p434_p13 = scmp.ne.s32.totalorder %s568_s7, %s433_s8  ;;  %p437_p0 = scmp.lt.u32.totalorder %s433_s8, %s568_s7 }
 0x2b0   :  { %p439_p1 = pnand %p437_p0, %p434_p13 }
 0x2b2   :  { %442 = shalt.err (!%p439_p1)
}
 0x2b3   :  { %337 = dma.vmem_to_hbm [thread:$0]  %s335_s28, 64, %s568_s7, [#allocation4]  }
 0x2b4   :  { %445 = dma.done.wait [#allocation4], 64  }
 0x2b5   :  { %446 = vsyncadd [#allocation4], 4294967232 }
 0x2b6   :  { %341 = vsyncpa [#allocation3], 1 }
 0x2b7   :  { %342 = vsyncpa [#allocation4], 1 }

</bundles_post_ra>
